<compile_context>
chip_gen: v6e
topology: v6e:2x2x1
jax: 0.10.0
libtpu: 0.0.40
codegen_flags: <defaults>
</compile_context>

<pallas_src>
import functools

import jax
import jax.numpy as jnp
from jax import lax
from jax.experimental import pallas as pl
from jax.experimental.pallas import tpu as pltpu


def _round_up(x, m):
    return ((x + m - 1) // m) * m


def _pick_vmem_limit():
    """Generation-aware VMEM limit (v7x: 64 MiB/TC, v5e/v6e: 128 MiB)."""
    phys = None
    try:
        info = pltpu.get_tpu_info()
        phys = getattr(info, "vmem_capacity_bytes", None)
    except Exception:
        phys = None
    if phys is None:
        phys = 64 * 1024 * 1024           # conservative: assume v7x-class
    if phys <= 64 * 1024 * 1024:
        return 48 * 1024 * 1024
    return 96 * 1024 * 1024


def _choose_sublanes(s_total, n_classes, itemsize, vmem_limit):
    """Pick the per-step sublane tile (rows of 128 lanes).

    Budget counts the double-buffered, dense input blocks plus ~6 float32
    temporaries of shape (C, sb, 128) live inside the body.  The (padded)
    VMEM budget is the only limit (no arbitrary lane cap).
    """
    min_sb = 8 if itemsize >= 4 else 16          # bf16 needs 16-row granules
    if s_total <= min_sb:
        return s_total                           # single full (ragged) block
    per_sb = 128 * (2 * (n_classes * itemsize + 4)   # score + int32 tgt, x2 bufs
                    + 6 * n_classes * 4)              # f32 temporaries
    budget = vmem_limit // 2
    max_sb = max(min_sb, budget // per_sb)
    sb = min_sb
    while sb * 2 <= max_sb and sb * 2 <= s_total:
        sb *= 2
    return sb


def _dice_kernel(score_ref, tgt_ref, out_ref, acc_ref, *,
                 n_classes, hw, sb, softmax, needs_mask):
    j = pl.program_id(2)                       # reduction (chunk) axis
    cpp = pl.num_programs(2)

    @pl.when(j == 0)
    def _init():
        acc_ref[...] = jnp.zeros_like(acc_ref)

    x = score_ref[0].astype(jnp.float32)       # (C, sb, 128), dense vregs
    tgt = tgt_ref[0]                           # (sb, 128) int32

    if softmax:
        # C is the leading (non-vreg) axis -> C-1 elementwise passes over
        # dense (sb, 128) vregs; reciprocal of the small denominator row runs
        # on the EUP (approx=False keeps the 1e-5 tolerance).
        m = jnp.max(x, axis=0, keepdims=True)
        e = jnp.exp(x - m)
        denom = jnp.sum(e, axis=0, keepdims=True)
        p = e * pl.reciprocal(denom, approx=False)
    else:
        p = x

    if needs_mask:
        # Positions >= H*W (wrapper pad, partial last block, or clamped tail
        # steps of the 2-way split) must contribute nothing.
        lc = pl.program_id(1) * cpp + j        # logical (unclamped) chunk idx
        s_idx = lax.broadcasted_iota(jnp.int32, (sb, 128), 0)
        l_idx = lax.broadcasted_iota(jnp.int32, (sb, 128), 1)
        flat = (lc * sb + s_idx) * 128 + l_idx
        valid = flat < hw
        p = jnp.where(valid[None], p, 0.0)     # mask p BEFORE z = p*p
        tgt = jnp.where(valid, tgt, n_classes)  # sentinel: matches no class

    classes = lax.broadcasted_iota(jnp.int32, (n_classes, 1, 1), 0)
    y_el = (tgt[None] == classes).astype(jnp.float32)   # one-hot (C, sb, 128)
    inter_el = p * y_el                                  # p already masked
    z_el = p * p

    # Lane-dense accumulation: sublane reduce (XLU slot, otherwise idle) down
    # to (C, 128); the single cross-lane reduce happens only in finalize.
    acc_ref[0] += jnp.sum(inter_el, axis=1)
    acc_ref[1] += jnp.sum(y_el, axis=1)
    acc_ref[2] += jnp.sum(z_el, axis=1)

    @pl.when(j == cpp - 1)
    def _finalize():
        out_ref[0, 0] = jnp.sum(acc_ref[...], axis=-1)   # (3, C)


def dice_loss_pallas(inputs, target, n_classes, weight=None, softmax=False):
    """Matches DiceLoss(n_classes).forward(inputs, target, weight, softmax)."""
    N, C, H, W = inputs.shape
    assert C == n_classes
    assert target.shape == (N, H, W)
    HW = H * W
    itemsize = jnp.dtype(inputs.dtype).itemsize

    # Lane-dense restructure: (N,C,H,W) -> (N,C,S,128), (N,H,W) -> (N,S,128).
    # Free reshapes when H*W % 128 == 0; otherwise one pad to a 128 multiple.
    score = inputs.reshape(N, C, HW)
    tgt = target.reshape(N, HW)
    if jnp.dtype(target.dtype) != jnp.int32:
        tgt = tgt.astype(jnp.int32)
    hw_pad = _round_up(HW, 128)
    if hw_pad != HW:
        score = jnp.pad(score, ((0, 0), (0, 0), (0, hw_pad - HW)))
        tgt = jnp.pad(tgt, ((0, 0), (0, hw_pad - HW)), constant_values=C)
    S = hw_pad // 128
    score = score.reshape(N, C, S, 128)
    tgt = tgt.reshape(N, S, 128)

    vmem_limit = _pick_vmem_limit()
    sb = _choose_sublanes(S, C, itemsize, vmem_limit)
    num_chunks = pl.cdiv(S, sb)

    # 2-way parallel split of the chunk axis so both v7x TensorCores get work
    # when the batch alone is too small / odd (harmless on v5e/v6e).
    P = 2 if (N % 2 == 1 and num_chunks >= 2) else 1
    cpp = pl.cdiv(num_chunks, P)
    needs_mask = (P * cpp * sb * 128) != HW
    last_blk = num_chunks - 1

    if P > 1:
        def chunk_idx(p, j):
            # Clamp keeps the DMA in range; out-of-range steps are fully
            # neutralized by the in-kernel position mask (flat >= H*W).
            return jnp.minimum(p * cpp + j, last_blk)
    else:
        def chunk_idx(p, j):
            return j

    kernel = functools.partial(
        _dice_kernel, n_classes=C, hw=HW, sb=sb,
        softmax=bool(softmax), needs_mask=needs_mask)

    cost = pl.CostEstimate(
        flops=(14 if softmax else 6) * N * C * HW,
        transcendentals=(N * C * HW if softmax else 0),
        bytes_accessed=N * HW * (C * itemsize + 4) + N * P * 3 * C * 4)

    partials = pl.pallas_call(
        kernel,
        out_shape=jax.ShapeDtypeStruct((N, P, 3, C), jnp.float32),
        grid_spec=pltpu.PrefetchScalarGridSpec(
            num_scalar_prefetch=0,
            grid=(N, P, cpp),
            in_specs=[
                pl.BlockSpec((1, C, sb, 128),
                             lambda n, p, j: (n, 0, chunk_idx(p, j), 0)),
                pl.BlockSpec((1, sb, 128),
                             lambda n, p, j: (n, chunk_idx(p, j), 0)),
            ],
            out_specs=pl.BlockSpec((1, 1, 3, C), lambda n, p, j: (n, p, 0, 0)),
            scratch_shapes=[pltpu.VMEM((3, C, 128), jnp.float32)],
        ),
        compiler_params=pltpu.CompilerParams(
            dimension_semantics=("parallel", "parallel", "arbitrary"),
            vmem_limit_bytes=vmem_limit),
        cost_estimate=cost,
    )(score, tgt)                                        # (N, P, 3, C)

    # Tiny plain-JAX glue: combine partial sums and apply the dice formula.
    sums = jnp.sum(partials, axis=(0, 1))                # (3, C)
    intersect, y_sum, z_sum = sums[0], sums[1], sums[2]
    smooth = 1e-05
    dice = (2.0 * intersect + smooth) / (z_sum + y_sum + smooth)
    per_class_loss = 1.0 - dice                          # (C,)

    if weight is None:
        weight = jnp.ones((C,), jnp.float32)
    else:
        weight = jnp.asarray(weight, jnp.float32)
    return jnp.sum(per_class_loss * weight) / n_classes


def dice_loss_ref(inputs, target, n_classes, weight=None, softmax=False):
    """Pure-JAX reference mirroring the PyTorch module."""
    if softmax:
        inputs = jax.nn.softmax(inputs, axis=1)
    smooth = 1e-05
    if weight is None:
        weight = [1.0] * n_classes
    loss = 0.0
    for i in range(n_classes):
        score = inputs[:, i].astype(jnp.float32)
        t = (target == i).astype(jnp.float32)
        intersect = jnp.sum(score * t)
        y_sum = jnp.sum(t * t)
        z_sum = jnp.sum(score * score)
        dice = 1.0 - (2 * intersect + smooth) / (z_sum + y_sum + smooth)
        loss = loss + dice * weight[i]
    return loss / n_classes


if __name__ == "__main__":
    key = jax.random.PRNGKey(0)
    k1, k2, k3, k4, k5, k6 = jax.random.split(key, 6)

    # 1) Primary shape (fused softmax path, exactly divisible H*W).
    N, C, H, W = 2, 4, 16, 16
    inputs = jax.random.uniform(k1, (N, C, H, W), dtype=jnp.float32)
    target = jax.random.randint(k2, (N, H, W), 0, C, dtype=jnp.int32)
    out = jax.block_until_ready(
        dice_loss_pallas(inputs, target, n_classes=C, softmax=True))
    ref = dice_loss_ref(inputs, target, n_classes=C, softmax=True)
    assert jnp.allclose(out, ref, atol=1e-5, rtol=1e-5), (out, ref)

    # 2) Ragged spatial size (wrapper pad + in-kernel tail mask) + weights.
    N2, C2, H2, W2 = 2, 4, 10, 13
    inputs2 = jax.random.uniform(k3, (N2, C2, H2, W2), dtype=jnp.float32)
    target2 = jax.random.randint(k4, (N2, H2, W2), 0, C2, dtype=jnp.int32)
    wts = [0.5, 1.0, 2.0, 1.5]
    out2 = jax.block_until_ready(
        dice_loss_pallas(inputs2, target2, n_classes=C2, weight=wts,
                         softmax=False))
    ref2 = dice_loss_ref(inputs2, target2, n_classes=C2, weight=wts,
                         softmax=False)
    assert jnp.allclose(out2, ref2, atol=1e-5, rtol=1e-5), (out2, ref2)

    # 3) Batch of 1: exercises the 2-way parallel chunk split (v7x megacore).
    N3, C3, H3, W3 = 1, 4, 48, 48
    inputs3 = jax.random.uniform(k5, (N3, C3, H3, W3), dtype=jnp.float32)
    target3 = jax.random.randint(k6, (N3, H3, W3), 0, C3, dtype=jnp.int32)
    out3 = jax.block_until_ready(
        dice_loss_pallas(inputs3, target3, n_classes=C3, softmax=True))
    ref3 = dice_loss_ref(inputs3, target3, n_classes=C3, softmax=True)
    assert jnp.allclose(out3, ref3, atol=1e-5, rtol=1e-5), (out3, ref3)

    print("KERNEL_OK")
</pallas_src>

<mosaic_0001>
module attributes {stable_mosaic.version = 11 : i64} {
  func.func @_dice_kernel(%arg0: i32, %arg1: i32, %arg2: i32, %arg3: memref<1x4x2x128xf32, #tpu.memory_space<vmem>>, %arg4: memref<1x2x128xi32, #tpu.memory_space<vmem>>, %arg5: memref<1x1x3x4xf32, #tpu.memory_space<vmem>>, %arg6: memref<3x4x128xf32, #tpu.memory_space<vmem>>) attributes {dimension_semantics = [#tpu.dimension_semantics<parallel>, #tpu.dimension_semantics<parallel>, #tpu.dimension_semantics<arbitrary>], iteration_bounds = array<i64: 2, 1, 1>, scalar_prefetch = 0 : i64, scratch_operands = 1 : i64, tpu.core_type = #tpu.core_type<tc>, window_params = [{transform_indices = @transform_0, window_bounds = array<i64: 1, 4, 2, 128>}, {transform_indices = @transform_1, window_bounds = array<i64: 1, 2, 128>}, {transform_indices = @transform_2, window_bounds = array<i64: 1, 1, 3, 4>}]} {
    %c0_i32 = arith.constant 0 : i32
    %0 = arith.cmpi eq, %arg2, %c0_i32 : i32
    %1 = arith.extui %0 : i1 to i32
    %c0_i32_0 = arith.constant 0 : i32
    %2 = arith.cmpi ne, %1, %c0_i32_0 : i32
    scf.if %2 {
      %cst_29 = arith.constant 0.000000e+00 : f32
      %50 = vector.broadcast %cst_29 : f32 to vector<3x4x128xf32>
      %c0_30 = arith.constant 0 : index
      %c0_31 = arith.constant 0 : index
      %c0_32 = arith.constant 0 : index
      %51 = vector.load %arg6[%c0_30, %c0_31, %c0_32] : memref<3x4x128xf32, #tpu.memory_space<vmem>>, vector<3x4x128xf32>
      tpu.vector_store %arg6[%c0_30, %c0_31, %c0_32], %50 {strides = array<i32>} : memref<3x4x128xf32, #tpu.memory_space<vmem>>, vector<3x4x128xf32>,
    } else {
    }
    %c0 = arith.constant 0 : index
    %c0_1 = arith.constant 0 : index
    %c0_2 = arith.constant 0 : index
    %c0_3 = arith.constant 0 : index
    %3 = vector.load %arg3[%c0, %c0_1, %c0_2, %c0_3] : memref<1x4x2x128xf32, #tpu.memory_space<vmem>>, vector<1x4x2x128xf32>
    %4 = vector.shape_cast %3 : vector<1x4x2x128xf32> to vector<4x2x128xf32>
    %c0_4 = arith.constant 0 : index
    %c0_5 = arith.constant 0 : index
    %c0_6 = arith.constant 0 : index
    %5 = vector.load %arg4[%c0_4, %c0_5, %c0_6] : memref<1x2x128xi32, #tpu.memory_space<vmem>>, vector<1x2x128xi32>
    %6 = vector.shape_cast %5 : vector<1x2x128xi32> to vector<2x128xi32>
    %cst = arith.constant dense<0xFF800000> : vector<2x128xf32>
    %7 = vector.multi_reduction <maximumf>, %4, %cst [0] : vector<4x2x128xf32> to vector<2x128xf32>
    %8 = vector.shape_cast %7 : vector<2x128xf32> to vector<1x2x128xf32>
    %9 = vector.broadcast %8 : vector<1x2x128xf32> to vector<4x2x128xf32>
    %10 = arith.subf %4, %9 : vector<4x2x128xf32>
    %11 = math.exp %10 : vector<4x2x128xf32>
    %cst_7 = arith.constant dense<0.000000e+00> : vector<2x128xf32>
    %12 = vector.multi_reduction <add>, %11, %cst_7 [0] : vector<4x2x128xf32> to vector<2x128xf32>
    %13 = vector.shape_cast %12 : vector<2x128xf32> to vector<1x2x128xf32>
    %14 = tpu.reciprocal %13 : vector<1x2x128xf32> -> vector<1x2x128xf32>
    %15 = vector.broadcast %14 : vector<1x2x128xf32> to vector<4x2x128xf32>
    %16 = arith.mulf %11, %15 : vector<4x2x128xf32>
    %17 = tpu.iota {dimensions = array<i32: 0>} : vector<4x1x1xi32>
    %18 = vector.shape_cast %6 : vector<2x128xi32> to vector<1x2x128xi32>
    %19 = vector.broadcast %18 : vector<1x2x128xi32> to vector<4x2x128xi32>
    %20 = vector.broadcast %17 : vector<4x1x1xi32> to vector<4x2x128xi32>
    %21 = arith.cmpi eq, %19, %20 : vector<4x2x128xi32>
    %22 = arith.extui %21 : vector<4x2x128xi1> to vector<4x2x128xi32>
    %23 = arith.sitofp %22 : vector<4x2x128xi32> to vector<4x2x128xf32>
    %24 = arith.mulf %16, %23 : vector<4x2x128xf32>
    %25 = arith.mulf %16, %16 : vector<4x2x128xf32>
    %c0_8 = arith.constant 0 : index
    %c0_9 = arith.constant 0 : index
    %c0_10 = arith.constant 0 : index
    %26 = vector.load %arg6[%c0_8, %c0_9, %c0_10] : memref<3x4x128xf32, #tpu.memory_space<vmem>>, vector<1x4x128xf32>
    %27 = vector.shape_cast %26 : vector<1x4x128xf32> to vector<4x128xf32>
    %cst_11 = arith.constant dense<0.000000e+00> : vector<4x128xf32>
    %28 = vector.multi_reduction <add>, %24, %cst_11 [1] : vector<4x2x128xf32> to vector<4x128xf32>
    %29 = arith.addf %27, %28 : vector<4x128xf32>
    %c0_12 = arith.constant 0 : index
    %c0_13 = arith.constant 0 : index
    %c0_14 = arith.constant 0 : index
    %30 = vector.load %arg6[%c0_12, %c0_13, %c0_14] : memref<3x4x128xf32, #tpu.memory_space<vmem>>, vector<1x4x128xf32>
    %31 = vector.shape_cast %30 : vector<1x4x128xf32> to vector<4x128xf32>
    %32 = vector.shape_cast %29 : vector<4x128xf32> to vector<1x4x128xf32>
    tpu.vector_store %arg6[%c0_12, %c0_13, %c0_14], %32 {strides = array<i32>} : memref<3x4x128xf32, #tpu.memory_space<vmem>>, vector<1x4x128xf32>,
    %c1 = arith.constant 1 : index
    %c0_15 = arith.constant 0 : index
    %c0_16 = arith.constant 0 : index
    %33 = vector.load %arg6[%c1, %c0_15, %c0_16] : memref<3x4x128xf32, #tpu.memory_space<vmem>>, vector<1x4x128xf32>
    %34 = vector.shape_cast %33 : vector<1x4x128xf32> to vector<4x128xf32>
    %cst_17 = arith.constant dense<0.000000e+00> : vector<4x128xf32>
    %35 = vector.multi_reduction <add>, %23, %cst_17 [1] : vector<4x2x128xf32> to vector<4x128xf32>
    %36 = arith.addf %34, %35 : vector<4x128xf32>
    %c1_18 = arith.constant 1 : index
    %c0_19 = arith.constant 0 : index
    %c0_20 = arith.constant 0 : index
    %37 = vector.load %arg6[%c1_18, %c0_19, %c0_20] : memref<3x4x128xf32, #tpu.memory_space<vmem>>, vector<1x4x128xf32>
    %38 = vector.shape_cast %37 : vector<1x4x128xf32> to vector<4x128xf32>
    %39 = vector.shape_cast %36 : vector<4x128xf32> to vector<1x4x128xf32>
    tpu.vector_store %arg6[%c1_18, %c0_19, %c0_20], %39 {strides = array<i32>} : memref<3x4x128xf32, #tpu.memory_space<vmem>>, vector<1x4x128xf32>,
    %c2 = arith.constant 2 : index
    %c0_21 = arith.constant 0 : index
    %c0_22 = arith.constant 0 : index
    %40 = vector.load %arg6[%c2, %c0_21, %c0_22] : memref<3x4x128xf32, #tpu.memory_space<vmem>>, vector<1x4x128xf32>
    %41 = vector.shape_cast %40 : vector<1x4x128xf32> to vector<4x128xf32>
    %cst_23 = arith.constant dense<0.000000e+00> : vector<4x128xf32>
    %42 = vector.multi_reduction <add>, %25, %cst_23 [1] : vector<4x2x128xf32> to vector<4x128xf32>
    %43 = arith.addf %41, %42 : vector<4x128xf32>
    %c2_24 = arith.constant 2 : index
    %c0_25 = arith.constant 0 : index
    %c0_26 = arith.constant 0 : index
    %44 = vector.load %arg6[%c2_24, %c0_25, %c0_26] : memref<3x4x128xf32, #tpu.memory_space<vmem>>, vector<1x4x128xf32>
    %45 = vector.shape_cast %44 : vector<1x4x128xf32> to vector<4x128xf32>
    %46 = vector.shape_cast %43 : vector<4x128xf32> to vector<1x4x128xf32>
    tpu.vector_store %arg6[%c2_24, %c0_25, %c0_26], %46 {strides = array<i32>} : memref<3x4x128xf32, #tpu.memory_space<vmem>>, vector<1x4x128xf32>,
    %c0_i32_27 = arith.constant 0 : i32
    %47 = arith.cmpi eq, %arg2, %c0_i32_27 : i32
    %48 = arith.extui %47 : i1 to i32
    %c0_i32_28 = arith.constant 0 : i32
    %49 = arith.cmpi ne, %48, %c0_i32_28 : i32
    scf.if %49 {
      %c0_29 = arith.constant 0 : index
      %c0_30 = arith.constant 0 : index
      %c0_31 = arith.constant 0 : index
      %50 = vector.load %arg6[%c0_29, %c0_30, %c0_31] : memref<3x4x128xf32, #tpu.memory_space<vmem>>, vector<3x4x128xf32>
      %cst_32 = arith.constant dense<0.000000e+00> : vector<3x4xf32>
      %51 = vector.multi_reduction <add>, %50, %cst_32 [2] : vector<3x4x128xf32> to vector<3x4xf32>
      %c0_33 = arith.constant 0 : index
      %c0_34 = arith.constant 0 : index
      %c0_35 = arith.constant 0 : index
      %c0_36 = arith.constant 0 : index
      %52 = vector.load %arg5[%c0_33, %c0_34, %c0_35, %c0_36] : memref<1x1x3x4xf32, #tpu.memory_space<vmem>>, vector<1x1x3x4xf32>
      %53 = vector.shape_cast %52 : vector<1x1x3x4xf32> to vector<3x4xf32>
      %54 = vector.shape_cast %51 : vector<3x4xf32> to vector<1x1x3x4xf32>
      tpu.vector_store %arg5[%c0_33, %c0_34, %c0_35, %c0_36], %54 {strides = array<i32>} : memref<1x1x3x4xf32, #tpu.memory_space<vmem>>, vector<1x1x3x4xf32>,
    } else {
    }
    return
  }
  func.func @transform_0(%arg0: i32, %arg1: i32, %arg2: i32) -> (i32, i32, i32, i32) {
    %c0_i32 = arith.constant 0 : i32
    %c0_i32_0 = arith.constant 0 : i32
    %c0_i32_1 = arith.constant 0 : i32
    return %arg0, %c0_i32, %arg2, %c0_i32_0 : i32, i32, i32, i32
  }
  func.func @transform_1(%arg0: i32, %arg1: i32, %arg2: i32) -> (i32, i32, i32) {
    %c0_i32 = arith.constant 0 : i32
    %c0_i32_0 = arith.constant 0 : i32
    return %arg0, %arg2, %c0_i32 : i32, i32, i32
  }
  func.func @transform_2(%arg0: i32, %arg1: i32, %arg2: i32) -> (i32, i32, i32, i32) {
    %c0_i32 = arith.constant 0 : i32
    %c0_i32_0 = arith.constant 0 : i32
    %c0_i32_1 = arith.constant 0 : i32
    return %arg0, %arg1, %c0_i32, %c0_i32_0 : i32, i32, i32, i32
  }
}

</mosaic_0001>

<bundles_post_ra>
// kernel: tpu_custom_call.1
= control target key start
LH: loop header
LB: loop body
LE: loop exit
PB: predicated region body
PF: predicated region fallthrough
CT: control target
= control target key end

     0   :  { %7 = vsyncpa [#allocation4], 0  ;;  %s964_s0 = inlined_call_operand.hbm [shape: f32[2,4,2,128], index: 0, kind: input, shape index: {}]   ;;  %s965_s1 = inlined_call_operand.hbm [shape: s32[2,2,128], index: 1, kind: input, shape index: {}]   ;;  %s966_s2 = inlined_call_operand.vmem [shape: f32[2,1,3,4], index: 2, kind: output, shape index: {}]  }
   0x1   :  { %9 = vsyncpa [#allocation4 + $0x1], 0 }
   0x2   :  { %10 = vsyncpa [#allocation6], 0 }
   0x3   :  { %12 = vsyncpa [#allocation6 + $0x1], 0  ;;  %s793_s9 = smov 0   ;;  %s795_s10 = smov 0  }
   0x4   :  { %s797_s11 = smov 0   ;;  %s799_s12 = smov 0  }
   0x5   :  { %s801_s13 = smov 0   ;;  %s803_s14 = smov 0  }
   0x6 LB: > { %s568_s15 = sadd.s32 4294967295, %s771_s14   ;;  %s37_s16 = sadd.s32 1, %s767_s13  ;;  %s771_s14 = sphi %s803_s14, %s18_s14   ;;  %s767_s13 = sphi %s801_s13, %s975_s13   ;;  %s763_s12 = sphi %s799_s12, %s974_s12   ;;  %s759_s11 = sphi %s797_s11, %s973_s11   ;;  %s755_s10 = sphi %s795_s10, %s972_s10   ;;  %s751_s9 = sphi %s793_s9, %s971_s9  }
   0x7   : > { %p39_p0 = scmp.ge.s32.totalorder %s37_s16, 2  ;;  %s46_s17 = sadd.s32 1, %s759_s11 }
   0x8   : > { %p53_p1 = scmp.ne.s32.totalorder %s759_s11, %s755_s10  ;;  %p54_p2 = scmp.eq.s32.totalorder %s771_s14, 0 }
   0x9   : > { %s977_s16 = smov (%p39_p0, %s37_s16), 0  ;;  %p59_p4 = scmp.ne.s32.totalorder %s755_s10, %s751_s9 }
   0xa   : > { %p829_p3 = por %p54_p2, %p53_p1  ;;  %s41_s19 = ssub.s32 %s767_s13, %s977_s16 }
   0xb   : > { %p60_p5 = scmp.eq.s32.totalorder %s568_s15, 0  ;;  %p44_p6 = scmp.eq.s32.totalorder %s41_s19, 0 }
   0xc   : > { %p599_p8 = scmp.lt.s32.totalorder %s771_s14, 2  ;;  %s845_s22 = sand.u32 1, %s759_s11  }
   0xd   : > { %p836_p7 = por %p60_p5, %p59_p4  ;;  %s587_s23 = sshll.u32 %s767_s13, 7 }
   0xe   : > { %s842_s21 = scalar_select %p44_p6, %s759_s11, %s46_s17  }
   0xf   : > { %s572_s24 = sshll.u32 %s845_s22, 3  ;;  %s150_s27 = scalar_lea.hbm %s964_s0, %s587_s23 }
  0x10   : > { %s143_s28 = scalar_lea.vmem [#allocation3], %s572_s24  ;;  %p854_p9 = pnand %p599_p8, %p829_p3 }
  0x11   : > { %s151_s29 = sshll.u32 %s143_s28, 4  ;;  %s140_s3 = scalar_lea.sflag [#allocation4], %s845_s22  ;;  %s152_s29 = int_to_ptr.vmem [resolvable:$true] %s151_s29 }
  0x12   : > { %p663_p10 = pneg %p854_p9  ;;  %s674_s4 = scalar_lea.vmem %s152_s29, 128 }
  0x13   : > { %p675_p11 = scmp.ne.s32.totalorder %s152_s29, %s674_s4  ;;  %s773_s5 = smov [#allocation3]  }
  0x14   : > { %s679_s6 = sshll.u32 %s773_s5, 4  ;;  %s680_s6 = int_to_ptr.vmem [resolvable:$false] %s679_s6 }
  0x15   : > { %p677_p12 = pnand %p675_p11, %p663_p10  ;;  %s681_s7 = scalar_lea.vmem %s680_s6, 256 }
  0x16   : > { %p682_p0 = scmp.lt.s32.totalorder %s152_s29, %s680_s6  ;;  %p683_p1 = scmp.lt.s32.totalorder %s681_s7, %s674_s4 }
  0x17   : > { %p678_p13 = pneg %p677_p12 }
  0x18   : > { %p684_p2 = por %p683_p1, %p682_p0 }
  0x1a   : > { %p685_p3 = pnand %p684_p2, %p678_p13 }
  0x1c   : > { %688 = shalt.err (!%p685_p3)
}
  0x1d   : > { %s774_s8 = smov 32   ;;  %s775_s9 = smov 2  }
  0x1e   : > { %595 = dma.hbm_to_vmem [thread:$0]  (!%p854_p9), %s150_s27, 128, %s152_s29, %s140_s3, %s774_s8, %s774_s8, %s775_s9  }
  0x1f   : > { %p577_p4 = scmp.ge.s32.totalorder %s771_s14, 1  ;;  %p178_p5 = scmp.lt.s32.totalorder %s771_s14, 3 }
  0x20   : > { %s575_s15 = sshll.u32 %s845_s22, 1  ;;  %s576_s18 = sshll.u32 %s767_s13, 5 }
  0x21   : > { %p869_p6 = pnand %p577_p4, %p178_p5  ;;  %s165_s19 = scalar_lea.vmem [#allocation5], %s575_s15 }
  0x22   : > { %s173_s23 = sshll.u32 %s165_s19, 4  ;;  %s171_s26 = scalar_lea.hbm %s965_s1, %s576_s18  ;;  %s174_s23 = int_to_ptr.vmem [resolvable:$true] %s173_s23 }
  0x23   : > { %s162_s28 = scalar_lea.sflag [#allocation6], %s845_s22  ;;  %s702_s4 = scalar_lea.vmem %s174_s23, 32 }
  0x24   : > { %p703_p8 = scmp.ne.s32.totalorder %s174_s23, %s702_s4  ;;  %s776_s27 = smov [#allocation5]  }
  0x25   : > { %s707_s29 = sshll.u32 %s776_s27, 4  ;;  %s708_s29 = int_to_ptr.vmem [resolvable:$false] %s707_s29 }
  0x26   : > { %p705_p11 = pnand %p703_p8, %p663_p10  ;;  %s709_s3 = scalar_lea.vmem %s708_s29, 64 }
  0x27   : > { %p710_p13 = scmp.lt.s32.totalorder %s174_s23, %s708_s29  ;;  %p711_p0 = scmp.lt.s32.totalorder %s709_s3, %s702_s4 }
  0x28   : > { %p706_p12 = pneg %p705_p11 }
  0x29   : > { %p712_p1 = por %p711_p0, %p710_p13 }
  0x2b   : > { %p713_p2 = pnand %p712_p1, %p706_p12 }
  0x2d   : > { %716 = shalt.err (!%p713_p2)
}
  0x2e   : > { %598 = dma.hbm_to_vmem [thread:$0]  (!%p854_p9), %s171_s26, 32, %s174_s23, %s162_s28  }
  0x2f   : > { %182 = sbr.rel (%p869_p6) target bundleno = 282 (0x11a), region = 28  ;;  %s184_s22 = sand.u32 (!%p869_p6), 1, %s755_s10  }
  0x30   : > { %s578_s5 = sshll.u32 (!%p869_p6), %s184_s22, 3  ;;  %s185_s6 = scalar_lea.sflag (!%p869_p6), [#allocation4], %s184_s22 }
  0x31   : > { %s188_s7 = scalar_lea.vmem (!%p869_p6), [#allocation3], %s578_s5 }
  0x34   : > { %742 = dma.done.wait (%p836_p7), %s185_s6, 128  }
  0x35   : > { %744 = vsyncadd (%p836_p7), %s185_s6, 4294967168  ;;  %s579_s8 = sshll.u32 %s184_s22, 1  ;;  %s194_s9 = scalar_lea.sflag [#allocation6], %s184_s22 }
  0x36   : > { %s197_s15 = scalar_lea.vmem [#allocation5], %s579_s8 }
  0x37   : > { %746 = dma.done.wait (%p836_p7), %s194_s9, 32  }
  0x38   : > { %748 = vsyncadd (%p836_p7), %s194_s9, 4294967264  ;;  %v777_v0 = vmov 0.0   ;;  %vm244_vm0 = vcmask 1041408   ;;  %v239_v1 = vld [vmem:[%s188_s7] sm:$0x3]  ;;  %vm329_vm5 = vcmask 1041409  }
  0x39   : > { %236 = vst [vmem:[#allocation2] sm:$0xf] %v777_v0  ;;  %237 = vst [vmem:[#allocation2 + $0x4] sm:$0xf] %v777_v0  ;;  %v240_v2 = vld [vmem:[%s188_s7 + $0x2] sm:$0x3] }
  0x3a   : > { %238 = vst [vmem:[#allocation2 + $0x8] sm:$0xf] %v777_v0  ;;  %v241_v3 = vld [vmem:[%s188_s7 + $0x4] sm:$0x3]  ;;  %v242_v4 = vld [vmem:[%s188_s7 + $0x6] sm:$0x3] }
  0x3b   : > { %v243_v5 = vld [vmem:[%s197_s15] sm:$0x3]  ;;  %v245_v6 = vsel %vm244_vm0, %v239_v1, -inf  ;;  %v246_v7 = vsel %vm244_vm0, %v240_v2, -inf  ;;  %v247_v8 = vsel %vm244_vm0, %v241_v3, -inf  ;;  %v248_v9 = vsel %vm244_vm0, %v242_v4, -inf }
  0x3c   : > { %v249_v10 = vmax.f32 %v245_v6, %v246_v7  ;;  %vm276_vm1 = vcmp.eq.s32.totalorder %v243_v5, 0  ;;  %v250_v11 = vmax.f32 %v247_v8, %v248_v9  ;;  %vm277_vm2 = vcmp.eq.s32.totalorder %v243_v5, 1  ;;  %p225_p7 = scmp.lt.s32.totalorder %s763_s12, 1 }
  0x3d   : > { %vm278_vm3 = vcmp.eq.s32.totalorder %v243_v5, 2  ;;  %vm279_vm4 = vcmp.eq.s32.totalorder %v243_v5, 3  ;;  %v898_v12 = vsel %vm276_vm1, 1.0, %v777_v0  ;;  %v900_v13 = vsel %vm277_vm2, 1.0, %v777_v0 }
  0x3e   : > { %v902_v14 = vsel %vm278_vm3, 1.0, %v777_v0  ;;  %v904_v15 = vsel %vm279_vm4, 1.0, %v777_v0  ;;  %v251_v16 = vmax.f32 %v249_v10, %v250_v11  ;;  %v340_v17 = vsel %vm244_vm0, %v898_v12, 0.0  ;;  %s979_s12 = smov (!%p225_p7, %s763_s12), 1 }
  0x3f   : > { %v347_v18 = vsel %vm244_vm0, %v900_v13, 0.0  ;;  %v354_v19 = vsel %vm244_vm0, %v902_v14, 0.0  ;;  %v341_v20 = vrot.slane %v340_v17, 4  ;;  %v361_v23 = vsel %vm244_vm0, %v904_v15, 0.0  ;;  %s580_s20 = sshll.u32 %s979_s12, 2 }
  0x40   : > { %v348_v21 = vrot.slane %v347_v18, 4  ;;  %v355_v22 = vrot.slane %v354_v19, 4  ;;  %v252_v24 = vsub.f32 %v239_v1, %v251_v16  ;;  %v253_v25 = vsub.f32 %v240_v2, %v251_v16  ;;  %v339_v53 = vld [vmem:[#allocation2 + $0x4] sm:$0xf]  ;;  %s231_s18 = scalar_lea.vmem %s966_s2, %s580_s20 }
  0x41   : > { %v254_v26 = vsub.f32 %v241_v3, %v251_v16  ;;  %v255_v27 = vsub.f32 %v242_v4, %v251_v16  ;;  %v342_v28 = vadd.f32 %v341_v20, %v340_v17  ;;  %v362_v31 = vrot.slane %v361_v23, 4 }
  0x42   : > { %v349_v29 = vadd.f32 %v348_v21, %v347_v18  ;;  %v356_v30 = vadd.f32 %v355_v22, %v354_v19  ;;  %v256_v32 = vmul.f32 1.442695, %v252_v24  ;;  %v258_v33 = vmul.f32 1.442695, %v253_v25 }
  0x43   : > { %v260_v34 = vmul.f32 1.442695, %v254_v26  ;;  %v262_v35 = vmul.f32 1.442695, %v255_v27  ;;  %v343_v36 = vrot.slane %v342_v28, 2  ;;  %v363_v39 = vadd.f32 %v362_v31, %v361_v23 }
  0x44   : > { %v350_v37 = vrot.slane %v349_v29, 2  ;;  %v357_v38 = vrot.slane %v356_v30, 2  ;;  %651 = vpow2.f32 %v256_v32  ;;  %vm331_vm6 = vcmask 1042434  }
  0x45   : > { %653 = vpow2.f32 %v258_v33  ;;  %v344_v40 = vadd.f32 %v343_v36, %v342_v28  ;;  %v364_v43 = vrot.slane %v363_v39, 2  ;;  %vm333_vm7 = vcmask 1043459  }
  0x46   : > { %v351_v41 = vadd.f32 %v350_v37, %v349_v29  ;;  %v358_v42 = vadd.f32 %v357_v38, %v356_v30  ;;  %655 = vpow2.f32 %v260_v34  ;;  %vm424_vm8 = vcmask 1043456  }
  0x47   : > { %657 = vpow2.f32 %v262_v35  ;;  %v345_v44 = vrot.slane %v344_v40, 1  ;;  %v365_v47 = vadd.f32 %v364_v43, %v363_v39  ;;  %vm454_vm9 = vcmask 26624  }
  0x48   : > { %v352_v45 = vrot.slane %v351_v41, 1  ;;  %v359_v46 = vrot.slane %v358_v42, 1 }
  0x49   : > { %v346_v48 = vadd.f32 %v345_v44, %v344_v40  ;;  %v366_v51 = vrot.slane %v365_v47, 1 }
  0x4a   : > { %v353_v49 = vadd.f32 %v352_v45, %v351_v41  ;;  %v360_v50 = vadd.f32 %v359_v46, %v358_v42 }
  0x4b   : > { %v367_v54 = vadd.f32 %v366_v51, %v365_v47 }
  0x4c   : > { %v372_v52 = vsel %vm329_vm5, %v353_v49, %v346_v48 }
  0x4d   : > { %v373_v55 = vsel %vm331_vm6, %v360_v50, %v372_v52 }
  0x4e   : > { %v374_v56 = vsel %vm333_vm7, %v367_v54, %v373_v55 }
  0x4f   : > { %v376_v57 = vadd.f32 %v374_v56, %v339_v53 }
  0x51   : > { %v652_v58 = vpop.eup %651  ;;  %377 = vst [vmem:[#allocation2 + $0x4] sm:$0xf] %v376_v57 }
  0x52   : > { %v654_v59 = vpop.eup %653  ;;  %v264_v60 = vsel %vm244_vm0, %v652_v58, 0.0 }
  0x53   : > { %v656_v61 = vpop.eup %655  ;;  %v265_v62 = vsel %vm244_vm0, %v654_v59, 0.0 }
  0x54   : > { %v658_v63 = vpop.eup %657  ;;  %v266_v0 = vadd.f32 %v265_v62, %v264_v60  ;;  %v267_v1 = vsel %vm244_vm0, %v656_v61, 0.0 }
  0x55   : > { %v269_v2 = vsel %vm244_vm0, %v658_v63, 0.0 }
  0x56   : > { %v268_v3 = vadd.f32 %v267_v1, %v266_v0 }
  0x58   : > { %v270_v4 = vadd.f32 %v269_v2, %v268_v3 }
  0x5a   : > { %659 = vrcp.f32 %v270_v4 }
  0x67   : > { %v660_v5 = vpop.eup %659 }
  0x68   : > { %v272_v6 = vmul.f32 %v660_v5, %v652_v58  ;;  %v273_v7 = vmul.f32 %v660_v5, %v654_v59  ;;  %v274_v8 = vmul.f32 %v660_v5, %v656_v61  ;;  %v275_v9 = vmul.f32 %v660_v5, %v658_v63 }
  0x6a   : > { %v288_v10 = vmul.f32 %v898_v12, %v272_v6  ;;  %v289_v11 = vmul.f32 %v900_v13, %v273_v7  ;;  %v290_v16 = vmul.f32 %v902_v14, %v274_v8  ;;  %v291_v17 = vmul.f32 %v904_v15, %v275_v9 }
  0x6b   : > { %v292_v18 = vmul.f32 %v272_v6, %v272_v6  ;;  %v293_v19 = vmul.f32 %v273_v7, %v273_v7  ;;  %v294_v20 = vmul.f32 %v274_v8, %v274_v8  ;;  %v295_v21 = vmul.f32 %v275_v9, %v275_v9  ;;  %v296_v6 = vld [vmem:[#allocation2] sm:$0xf] }
  0x6c   : > { %v297_v22 = vsel %vm244_vm0, %v288_v10, 0.0  ;;  %v304_v23 = vsel %vm244_vm0, %v289_v11, 0.0  ;;  %v311_v24 = vsel %vm244_vm0, %v290_v16, 0.0  ;;  %v318_v25 = vsel %vm244_vm0, %v291_v17, 0.0 }
  0x6d   : > { %v298_v26 = vrot.slane %v297_v22, 4  ;;  %v305_v12 = vrot.slane %v304_v23, 4  ;;  %v312_v27 = vrot.slane %v311_v24, 4  ;;  %v319_v13 = vrot.slane %v318_v25, 4 }
  0x6e   : > { %v380_v14 = vsel %vm244_vm0, %v292_v18, 0.0  ;;  %v387_v15 = vsel %vm244_vm0, %v293_v19, 0.0  ;;  %v394_v28 = vsel %vm244_vm0, %v294_v20, 0.0  ;;  %v401_v29 = vsel %vm244_vm0, %v295_v21, 0.0  ;;  %v379_v19 = vld [vmem:[#allocation2 + $0x8] sm:$0xf] }
  0x6f   : > { %v299_v30 = vadd.f32 %v298_v26, %v297_v22  ;;  %v306_v31 = vadd.f32 %v305_v12, %v304_v23  ;;  %v313_v32 = vadd.f32 %v312_v27, %v311_v24  ;;  %v320_v33 = vadd.f32 %v319_v13, %v318_v25  ;;  %v422_v25 = vld [vmem:[#allocation2 + $0x4] sm:$0xf] }
  0x70   : > { %v381_v34 = vrot.slane %v380_v14, 4  ;;  %v388_v35 = vrot.slane %v387_v15, 4  ;;  %v395_v36 = vrot.slane %v394_v28, 4  ;;  %v402_v37 = vrot.slane %v401_v29, 4 }
  0x71   : > { %v300_v38 = vrot.slane %v299_v30, 2  ;;  %v307_v39 = vrot.slane %v306_v31, 2  ;;  %v314_v40 = vrot.slane %v313_v32, 2  ;;  %v321_v41 = vrot.slane %v320_v33, 2 }
  0x72   : > { %v382_v42 = vadd.f32 %v381_v34, %v380_v14  ;;  %v389_v43 = vadd.f32 %v388_v35, %v387_v15  ;;  %v396_v44 = vadd.f32 %v395_v36, %v394_v28  ;;  %v403_v45 = vadd.f32 %v402_v37, %v401_v29 }
  0x73   : > { %v301_v46 = vadd.f32 %v300_v38, %v299_v30  ;;  %v308_v47 = vadd.f32 %v307_v39, %v306_v31  ;;  %v315_v48 = vadd.f32 %v314_v40, %v313_v32  ;;  %v322_v49 = vadd.f32 %v321_v41, %v320_v33 }
  0x74   : > { %v383_v50 = vrot.slane %v382_v42, 2  ;;  %v390_v51 = vrot.slane %v389_v43, 2  ;;  %v397_v52 = vrot.slane %v396_v44, 2  ;;  %v404_v53 = vrot.slane %v403_v45, 2 }
  0x75   : > { %v302_v54 = vrot.slane %v301_v46, 1  ;;  %v309_v55 = vrot.slane %v308_v47, 1  ;;  %v316_v56 = vrot.slane %v315_v48, 1  ;;  %v323_v57 = vrot.slane %v322_v49, 1 }
  0x76   : > { %v384_v58 = vadd.f32 %v383_v50, %v382_v42  ;;  %v391_v59 = vadd.f32 %v390_v51, %v389_v43  ;;  %v398_v60 = vadd.f32 %v397_v52, %v396_v44  ;;  %v405_v61 = vadd.f32 %v404_v53, %v403_v45 }
  0x77   : > { %v303_v62 = vadd.f32 %v302_v54, %v301_v46  ;;  %v310_v63 = vadd.f32 %v309_v55, %v308_v47  ;;  %v317_v0 = vadd.f32 %v316_v56, %v315_v48  ;;  %v324_v1 = vadd.f32 %v323_v57, %v322_v49 }
  0x78   : > { %v385_v2 = vrot.slane %v384_v58, 1  ;;  %v392_v3 = vrot.slane %v391_v59, 1  ;;  %v399_v4 = vrot.slane %v398_v60, 1  ;;  %v406_v5 = vrot.slane %v405_v61, 1 }
  0x79   : > { %v330_v7 = vsel %vm329_vm5, %v310_v63, %v303_v62  ;;  %v428_v12 = vsel %vm424_vm8, %v422_v25, 0.0  ;;  %v437_v14 = vlaneseq }
  0x7a   : > { %v332_v8 = vsel %vm331_vm6, %v317_v0, %v330_v7  ;;  %v386_v9 = vadd.f32 %v385_v2, %v384_v58  ;;  %v393_v10 = vadd.f32 %v392_v3, %v391_v59  ;;  %v400_v11 = vadd.f32 %v399_v4, %v398_v60 }
  0x7b   : > { %v334_v16 = vsel %vm333_vm7, %v324_v1, %v332_v8  ;;  %v407_v17 = vadd.f32 %v406_v5, %v405_v61  ;;  %v438_v15 = vand.u32 127, %v437_v14  ;;  %v440_v28 = vshrl.u32 %v437_v14, 7 }
  0x7c   : > { %v336_v18 = vadd.f32 %v334_v16, %v296_v6  ;;  %v412_v20 = vsel %vm329_vm5, %v393_v10, %v386_v9 }
  0x7d   : > { %v413_v21 = vsel %vm331_vm6, %v400_v11, %v412_v20  ;;  %v441_v30 = vsub.s32 %v438_v15, %v440_v28 }
  0x7e   : > { %337 = vst [vmem:[#allocation2] sm:$0xf] %v336_v18  ;;  %v414_v22 = vsel %vm333_vm7, %v407_v17, %v413_v21 }
  0x7f   : > { %v416_v23 = vadd.f32 %v414_v22, %v379_v19 }
  0x81   : > { %417 = vst [vmem:[#allocation2 + $0x8] sm:$0xf] %v416_v23 }
  0x85   : > { %v421_v24 = vld [vmem:[#allocation2] sm:$0xf] }
  0x86   : > { %v425_v26 = vsel %vm424_vm8, %v421_v24, 0.0 }
  0x87   : > { %426 = vadd.xlane.f32.xlu0 %v425_v26 }
  0x88   : > { %v423_v27 = vld [vmem:[#allocation2 + $0x8] sm:$0xf] }
  0x89   : > { %v431_v13 = vsel %vm424_vm8, %v423_v27, 0.0 }
  0x8a   : > { %432 = vadd.xlane.f32.xlu1 %v431_v13 }
  0x8b   : > { %429 = vadd.xlane.f32.xlu0 %v428_v12 }
 0x110   : > { %v427_v29 = vpop.xlane.xlu0 %426 }
 0x111   : > { %v442_v34 = vrot.slane %v427_v29, %v441_v30 }
 0x113   : > { %v433_v31 = vpop.xlane.xlu1 %432 }
 0x114   : > { %v430_v32 = vpop.xlane.xlu0 %429  ;;  %v450_v33 = vrot.slane %v433_v31, %v441_v30 }
 0x115   : > { %v446_v35 = vrot.slane %v430_v32, %v441_v30 }
 0x117   : > { %v451_v36 = vsel %vm329_vm5, %v446_v35, %v442_v34 }
 0x118   : > { %v452_v37 = vsel %vm331_vm6, %v450_v33, %v451_v36 }
 0x119   : > { %455 = vst.msk [vmem:[%s231_s18] sm:$0x7] %vm454_vm9, %v452_v37 }
 0x11a PF: > { %s18_s14 = sadd.s32 1, %s771_s14   ;;  %s971_s9 = smov %s755_s10 }
 0x11b   : > { %p15_p9 = scmp.ge.s32.totalorder %s18_s14, 4   ;;  %s972_s10 = smov %s759_s11 }
 0x11c   : > { %s973_s11 = smov %s842_s21  ;;  %s974_s12 = smov %s767_s13 }
 0x11d   : > { %s975_s13 = smov %s977_s16  ;;  %17 = sbr.rel (!%p15_p9) target bundleno = 6 (0x6), region = 91 }
 0x122   :  { %481 = vsyncpa [#allocation4], 1 }
 0x123   :  { %483 = vsyncpa [#allocation4 + $0x1], 1 }
 0x124   :  { %484 = vsyncpa [#allocation6], 1 }
 0x125   :  { %486 = vsyncpa [#allocation6 + $0x1], 1 }

</bundles_post_ra>
